<compile_context>
chip_gen: v7x
topology: tpu7x:2x2x1
jax: 0.10.0
libtpu: 0.0.40
codegen_flags: <defaults>
</compile_context>

<pallas_src>
import jax
import jax.numpy as jnp
from jax.experimental import pallas as pl
from jax.experimental.pallas import tpu as pltpu


# ------------------------------ device / tiling helpers ------------------------------ #

_MATMUL_TM = 256            # M tile (8-aligned, MXU friendly)
_MATMUL_TN_FALLBACK = 256   # only used when K must stay tiled
_MATMUL_TK_FALLBACK = 512


def _tpu_generation():
    try:
        kind = jax.devices()[0].device_kind.lower()
    except Exception:  # pragma: no cover
        return 6
    for g in (7, 6, 5):
        if f"v{g}" in kind or f"tpu{g}" in kind:
            return g
    return 6


def _vmem_budget_and_limit(gen):
    """(working-set budget, scoped-vmem limit) per TPU generation."""
    if gen >= 7:                              # v7x: 64 MiB physical VMEM / TC
        return 24 * 1024 * 1024, 40 * 1024 * 1024
    return 48 * 1024 * 1024, 64 * 1024 * 1024  # v5e / v6e: 128 MiB physical VMEM


def _pick_elementwise_rows(M, H, n_arrays, itemsize, gen, budget, cap=None):
    """Rows per tile for memory-bound elementwise kernels (review recs 4,6,7,8)."""
    if gen >= 7:
        per_step_bytes = 6 * 1024 * 1024              # >= ~4 MiB/step total @ 3.2 TB/s
    elif gen <= 5:
        per_step_bytes = n_arrays * 2 * 1024 * 1024   # ~2 MiB per operand on v5e
    else:
        per_step_bytes = n_arrays * 4 * 1024 * 1024   # ~512-1024 rows sweet spot on v6e
    per_step_bytes = min(per_step_bytes, budget // 2)  # double-buffering headroom
    rows = per_step_bytes // (n_arrays * H * itemsize)
    rows = max(8, min(rows, 2048))
    if cap is not None:
        rows = min(rows, cap)
    if rows >= M:
        return M                                      # single block == full array dim
    if gen >= 7 and M >= 32:
        # guarantee >= 4 grid steps: both v7x TensorCores get work and the DMA
        # pipeline has something to overlap.
        rows = min(rows, max(8, ((M // 4) // 8) * 8))
    return max(8, (rows // 8) * 8)


def _largest_aligned_tile(dim, preferred, align):
    """Largest multiple of `align` dividing `dim`, capped at `preferred`; falls back to
    the full dim (block == full dim waives the (8,128) constraint) if unaligned."""
    if dim % align != 0:
        return dim
    t = min((preferred // align) * align, dim)
    while t > align and dim % t != 0:
        t -= align
    return t if (t >= align and dim % t == 0) else dim


# ------------------------------ kernels ----------------------------------------------- #

def _gate_merge_kernel(g_ref, x1_ref, x2_ref, o_ref):
    # g_ref: (1, 2) f32 SMEM holding [sigmoid(p), 1 - sigmoid(p)] (computed in f32
    # wrapper-side so the two coefficients sum to exactly 1).
    g = g_ref[0, 0]
    one_minus_g = g_ref[0, 1]
    o_ref[...] = (g * x1_ref[...].astype(jnp.float32)
                  + one_minus_g * x2_ref[...].astype(jnp.float32)).astype(o_ref.dtype)


def _sum2_kernel(x1_ref, x2_ref, o_ref):
    o_ref[...] = x1_ref[...] + x2_ref[...]


def _sum3_kernel(x1_ref, x2_ref, x3_ref, o_ref):
    o_ref[...] = x1_ref[...] + x2_ref[...] + x3_ref[...]


def _linear_merge_fullk_kernel(x1_ref, x2_ref, w1_ref, w2_ref, b_ref, o_ref):
    # y = cat([x1, x2]) @ W^T + b == x1 @ W1^T + x2 @ W2^T + b, whole K resident in VMEM.
    wd = w1_ref.dtype
    acc = jnp.dot(x1_ref[...].astype(wd), w1_ref[...],
                  preferred_element_type=jnp.float32)
    acc = acc + jnp.dot(x2_ref[...].astype(wd), w2_ref[...],
                        preferred_element_type=jnp.float32)
    o_ref[...] = (acc + b_ref[...].astype(jnp.float32)).astype(o_ref.dtype)


def _linear_merge_ktiled_kernel(x1_ref, x2_ref, w1_ref, w2_ref, b_ref, o_ref, acc_ref):
    # Fallback when H is too large for VMEM-resident weights.
    k = pl.program_id(2)

    @pl.when(k == 0)
    def _():
        # bias-seeded init: removes the epilogue bias-add + cast from the critical path.
        acc_ref[...] = jnp.broadcast_to(b_ref[...].astype(jnp.float32), acc_ref.shape)

    wd = w1_ref.dtype
    acc_ref[...] += jnp.dot(x1_ref[...].astype(wd), w1_ref[...],
                            preferred_element_type=jnp.float32)
    acc_ref[...] += jnp.dot(x2_ref[...].astype(wd), w2_ref[...],
                            preferred_element_type=jnp.float32)

    @pl.when(k == pl.num_programs(2) - 1)
    def _():
        o_ref[...] = acc_ref[...].astype(o_ref.dtype)


# ------------------------------ call wrappers ------------------------------------------ #

def _elementwise_call(kernel, out_dtype, smem_args, arrays, flops, row_cap=None):
    M, H = arrays[0].shape
    itemsize = max(max(a.dtype.itemsize for a in arrays), jnp.dtype(out_dtype).itemsize)
    gen = _tpu_generation()
    budget, vmem_limit = _vmem_budget_and_limit(gen)
    n_arrays = len(arrays) + 1                     # inputs + output
    tm = _pick_elementwise_rows(M, H, n_arrays, itemsize, gen, budget, cap=row_cap)
    grid = (pl.cdiv(M, tm),)

    tile_spec = pl.BlockSpec((tm, H), lambda i: (i, 0))
    smem_specs = [pl.BlockSpec(memory_space=pltpu.MemorySpace.SMEM) for _ in smem_args]

    bytes_accessed = sum(a.size * a.dtype.itemsize for a in arrays)
    bytes_accessed += M * H * jnp.dtype(out_dtype).itemsize
    bytes_accessed += sum(int(s.size) * s.dtype.itemsize for s in smem_args)

    return pl.pallas_call(
        kernel,
        out_shape=jax.ShapeDtypeStruct((M, H), out_dtype),
        grid=grid,
        in_specs=smem_specs + [tile_spec] * len(arrays),
        out_specs=tile_spec,
        compiler_params=pltpu.CompilerParams(
            dimension_semantics=("parallel",),
            vmem_limit_bytes=vmem_limit),
        cost_estimate=pl.CostEstimate(
            flops=int(flops), transcendentals=0, bytes_accessed=int(bytes_accessed)),
    )(*smem_args, *arrays)


def _linear_call(x1f, x2f, w1t, w2t, b2d, out_dtype, max_rows=None, force_ktiled=False):
    M, H = x1f.shape
    gen = _tpu_generation()
    budget, vmem_limit = _vmem_budget_and_limit(gen)

    act_bytes = x1f.dtype.itemsize
    w_bytes = w1t.dtype.itemsize
    out_bytes = jnp.dtype(out_dtype).itemsize

    tm = M if M <= _MATMUL_TM else _MATMUL_TM
    if max_rows is not None and M > max_rows:
        tm = max(8, (min(tm, max_rows) // 8) * 8)
    n_i = pl.cdiv(M, tm)

    flops = 2 * M * (2 * H) * H + M * H

    # --- preferred path: collapse K (and usually N) -> each operand streamed once ----- #
    def fullk_working_set(tn_):
        return (2 * 2 * tm * H * act_bytes          # x1/x2 tiles, double-buffered
                + 2 * 2 * H * tn_ * w_bytes         # W1^T/W2^T tiles
                + 2 * tm * tn_ * out_bytes          # output tile
                + 2 * tn_ * 4)                      # bias

    tn = H
    if gen >= 7 and n_i == 1 and H % 256 == 0:
        tn = H // 2        # single M block on v7x: split N so both TensorCores get work
    while tn > 128 and H % 128 == 0 and fullk_working_set(tn) > budget:
        half = tn // 2
        tn = half if (half % 128 == 0 and H % half == 0) else 128
    use_fullk = (not force_ktiled) and fullk_working_set(tn) <= budget and H % tn == 0

    if use_fullk:
        n_j = H // tn
        grid = (n_i, n_j)
        # x blocks (i, 0) stay resident across j; weights re-streamed only if n_j > 1.
        w_restream = n_i if n_j > 1 else 1
        bytes_accessed = ((x1f.size + x2f.size) * act_bytes
                          + (w1t.size + w2t.size) * w_bytes * w_restream
                          + b2d.size * b2d.dtype.itemsize
                          + M * H * out_bytes)
        return pl.pallas_call(
            _linear_merge_fullk_kernel,
            out_shape=jax.ShapeDtypeStruct((M, H), out_dtype),
            grid=grid,
            in_specs=[
                pl.BlockSpec((tm, H), lambda i, j: (i, 0)),    # x1
                pl.BlockSpec((tm, H), lambda i, j: (i, 0)),    # x2
                pl.BlockSpec((H, tn), lambda i, j: (0, j)),    # W1^T
                pl.BlockSpec((H, tn), lambda i, j: (0, j)),    # W2^T
                pl.BlockSpec((1, tn), lambda i, j: (0, j)),    # bias
            ],
            out_specs=pl.BlockSpec((tm, tn), lambda i, j: (i, j)),
            compiler_params=pltpu.CompilerParams(
                dimension_semantics=("parallel", "parallel"),
                vmem_limit_bytes=vmem_limit),
            cost_estimate=pl.CostEstimate(
                flops=int(flops), transcendentals=0,
                bytes_accessed=int(bytes_accessed)),
        )(x1f, x2f, w1t, w2t, b2d)

    # --- fallback: 3-D tiled MXU matmul with f32 accumulator (K too big for VMEM) ----- #
    tn = _largest_aligned_tile(H, _MATMUL_TN_FALLBACK, 128)
    tk = _largest_aligned_tile(H, _MATMUL_TK_FALLBACK, 128)
    n_j, n_k = H // tn, H // tk
    grid = (n_i, n_j, n_k)
    bytes_accessed = ((x1f.size + x2f.size) * act_bytes * n_j   # acts re-streamed per j
                      + (w1t.size + w2t.size) * w_bytes * n_i   # weights re-streamed per i
                      + b2d.size * b2d.dtype.itemsize
                      + M * H * out_bytes)
    return pl.pallas_call(
        _linear_merge_ktiled_kernel,
        out_shape=jax.ShapeDtypeStruct((M, H), out_dtype),
        grid=grid,
        in_specs=[
            pl.BlockSpec((tm, tk), lambda i, j, k: (i, k)),     # x1
            pl.BlockSpec((tm, tk), lambda i, j, k: (i, k)),     # x2
            pl.BlockSpec((tk, tn), lambda i, j, k: (k, j)),     # W1^T
            pl.BlockSpec((tk, tn), lambda i, j, k: (k, j)),     # W2^T
            pl.BlockSpec((1, tn), lambda i, j, k: (0, j)),      # bias
        ],
        out_specs=pl.BlockSpec((tm, tn), lambda i, j, k: (i, j)),
        scratch_shapes=[pltpu.VMEM((tm, tn), jnp.float32)],
        compiler_params=pltpu.CompilerParams(
            dimension_semantics=("parallel", "parallel", "arbitrary"),
            vmem_limit_bytes=vmem_limit),
        cost_estimate=pl.CostEstimate(
            flops=int(flops), transcendentals=0,
            bytes_accessed=int(bytes_accessed)),
    )(x1f, x2f, w1t, w2t, b2d)


# ------------------------------ module -------------------------------------------------- #

class KgAdapterInfoMerge:
    """JAX/Pallas merge of (B, S, H) hidden states: gate / linear / sum.

    Linear weights default to bfloat16 (MXU-native); activations are cast to the weight
    dtype in-kernel while accumulation stays f32 — numerics differ slightly from an
    all-f32 reference (pass param_dtype=jnp.float32 for f32 semantics).
    """

    def __init__(self, method, hidden_size, key=None, param_dtype=jnp.bfloat16,
                 max_tile_rows=None, max_matmul_rows=None, force_ktiled=False):
        self.method = method
        self.hidden_size = hidden_size
        self.max_tile_rows = max_tile_rows
        self.max_matmul_rows = max_matmul_rows
        self.force_ktiled = force_ktiled
        if method == "gate":
            # nn.Parameter(torch.zeros(1))
            self.side_gate_params = jnp.zeros((1,), jnp.float32)
        elif method == "linear":
            # nn.Linear(2H, H): W (H, 2H), b (H,)
            if key is None:
                key = jax.random.PRNGKey(0)
            kw, kb = jax.random.split(key)
            bound = 1.0 / (2.0 * hidden_size) ** 0.5
            self.W = jax.random.uniform(kw, (hidden_size, 2 * hidden_size),
                                        jnp.float32, -bound, bound)
            self.b = jax.random.uniform(kb, (hidden_size,), jnp.float32, -bound, bound)
            # One-time split + transpose (no per-call transpose HLO); bf16 storage by
            # default halves weight DMA bytes and resident VMEM footprint.
            self.w1t = jnp.asarray(self.W[:, :hidden_size].T, dtype=param_dtype)
            self.w2t = jnp.asarray(self.W[:, hidden_size:].T, dtype=param_dtype)
            self.b2d = jnp.asarray(self.b.reshape(1, hidden_size), dtype=jnp.float32)

    def __call__(self, x1, x2, x3=None):
        B, S, H = x1.shape
        M = B * S
        x1f = x1.reshape(M, H)
        x2f = x2.reshape(M, H)

        if self.method == "gate":
            # sigmoid and (1 - sigmoid) computed in f32 wrapper-side, passed via SMEM.
            g = jax.nn.sigmoid(self.side_gate_params[0]).astype(jnp.float32)
            g2 = jnp.stack([g, 1.0 - g]).reshape(1, 2)
            out = _elementwise_call(_gate_merge_kernel, x1.dtype, [g2], [x1f, x2f],
                                    flops=3 * M * H, row_cap=self.max_tile_rows)

        elif self.method == "linear":
            if x3 is not None:
                # TODO(synk): reference module feeds a 3H vector into a 2H->H Linear
                # when x3 is given (shape error in the original); not implemented.
                raise NotImplementedError(
                    "linear merge with x3 is shape-inconsistent in the reference")
            out = _linear_call(x1f, x2f, self.w1t, self.w2t, self.b2d, x1.dtype,
                               max_rows=self.max_matmul_rows,
                               force_ktiled=self.force_ktiled)

        else:
            if x3 is None:
                out = _elementwise_call(_sum2_kernel, x1.dtype, [], [x1f, x2f],
                                        flops=M * H, row_cap=self.max_tile_rows)
            else:
                out = _elementwise_call(_sum3_kernel, x1.dtype, [],
                                        [x1f, x2f, x3.reshape(M, H)],
                                        flops=2 * M * H, row_cap=self.max_tile_rows)

        return out.reshape(B, S, H)


# ------------------------------ demo / check -------------------------------------------- #

def _bf16_linear_ref(x1, x2, W, b):
    """Reference with bf16 inputs/weights and f32 accumulation (matches bf16 kernel)."""
    cat = jnp.concatenate([x1, x2], axis=-1).astype(jnp.bfloat16)
    Wb = W.astype(jnp.bfloat16)
    return jnp.einsum("bsk,hk->bsh", cat, Wb,
                      preferred_element_type=jnp.float32) + b


if __name__ == "__main__":
    B, S, H = 2, 8, 32
    key = jax.random.PRNGKey(0)
    k1, k2, k3, kp = jax.random.split(key, 4)
    x1 = jax.random.normal(k1, (B, S, H), jnp.float32)
    x2 = jax.random.normal(k2, (B, S, H), jnp.float32)
    x3 = jax.random.normal(k3, (B, S, H), jnp.float32)

    # --- gate (single block) ---
    mod_gate = KgAdapterInfoMerge("gate", H)
    y_gate = jax.block_until_ready(mod_gate(x1, x2))
    g = jax.nn.sigmoid(mod_gate.side_gate_params[0])
    ref_gate = g * x1 + (1.0 - g) * x2
    assert jnp.allclose(y_gate, ref_gate, atol=1e-5), "gate mismatch"

    # --- gate (forced multi-step grid: SMEM scalars + pipelining) ---
    mod_gate_t = KgAdapterInfoMerge("gate", H, max_tile_rows=8)
    y_gate_t = jax.block_until_ready(mod_gate_t(x1, x2))
    assert jnp.allclose(y_gate_t, ref_gate, atol=1e-5), "tiled gate mismatch"

    # --- linear, f32 weights, collapsed-K path (small H) ---
    mod_lin = KgAdapterInfoMerge("linear", H, key=kp, param_dtype=jnp.float32)
    y_lin = jax.block_until_ready(mod_lin(x1, x2))
    cat = jnp.concatenate([x1, x2], axis=-1)
    ref_lin = jnp.einsum("bsk,hk->bsh", cat, mod_lin.W) + mod_lin.b
    assert jnp.allclose(y_lin, ref_lin, atol=2e-2, rtol=2e-2), "linear(f32) mismatch"

    # --- linear, default bf16 weights, collapsed-K path (H=1024, all weights VMEM-resident) ---
    H2, B2, S2 = 1024, 1, 64
    ka, kb_, kw2 = jax.random.split(jax.random.PRNGKey(1), 3)
    xa = jax.random.normal(ka, (B2, S2, H2), jnp.float32)
    xb = jax.random.normal(kb_, (B2, S2, H2), jnp.float32)
    mod_lin2 = KgAdapterInfoMerge("linear", H2, key=kw2)          # bf16 weights
    y_lin2 = jax.block_until_ready(mod_lin2(xa, xb))
    ref_lin2 = _bf16_linear_ref(xa, xb, mod_lin2.W, mod_lin2.b)
    assert jnp.allclose(y_lin2, ref_lin2, atol=2e-2, rtol=2e-2), "linear(bf16) mismatch"

    # --- linear, forced fallback K-tiled path (exercises pl.when bias-seeded accumulator) ---
    mod_lin3 = KgAdapterInfoMerge("linear", H2, key=kw2, force_ktiled=True)
    y_lin3 = jax.block_until_ready(mod_lin3(xa, xb))
    assert jnp.allclose(y_lin3, ref_lin2, atol=2e-2, rtol=2e-2), "linear(ktiled) mismatch"

    # --- linear, ragged M (M % tm != 0) to exercise masked partial-block stores ---
    H3, B3, S3 = 256, 1, 320
    kr1, kr2, kw3 = jax.random.split(jax.random.PRNGKey(2), 3)
    xr1 = jax.random.normal(kr1, (B3, S3, H3), jnp.float32)
    xr2 = jax.random.normal(kr2, (B3, S3, H3), jnp.float32)
    mod_lin4 = KgAdapterInfoMerge("linear", H3, key=kw3, max_matmul_rows=128)
    y_lin4 = jax.block_until_ready(mod_lin4(xr1, xr2))
    ref_lin4 = _bf16_linear_ref(xr1, xr2, mod_lin4.W, mod_lin4.b)
    assert jnp.allclose(y_lin4, ref_lin4, atol=2e-2, rtol=2e-2), "linear(ragged M) mismatch"

    # --- sum (default) ---
    mod_sum = KgAdapterInfoMerge("sum", H)
    y_sum2 = jax.block_until_ready(mod_sum(x1, x2))
    assert jnp.allclose(y_sum2, x1 + x2, atol=1e-6), "sum2 mismatch"
    y_sum3 = jax.block_until_ready(mod_sum(x1, x2, x3))
    assert jnp.allclose(y_sum3, x1 + x2 + x3, atol=1e-6), "sum3 mismatch"

    # --- sum (forced multi-step grid) ---
    mod_sum_t = KgAdapterInfoMerge("sum", H, max_tile_rows=8)
    y_sum3_t = jax.block_until_ready(mod_sum_t(x1, x2, x3))
    assert jnp.allclose(y_sum3_t, x1 + x2 + x3, atol=1e-6), "tiled sum3 mismatch"

    print("KERNEL_OK")
</pallas_src>

<mosaic_0001>
module attributes {stable_mosaic.version = 11 : i64} {
  func.func @_gate_merge_kernel(%arg0: i32, %arg1: memref<1x2xf32, #tpu.memory_space<smem>>, %arg2: memref<16x32xf32, #tpu.memory_space<vmem>>, %arg3: memref<16x32xf32, #tpu.memory_space<vmem>>, %arg4: memref<16x32xf32, #tpu.memory_space<vmem>>) attributes {dimension_semantics = [#tpu.dimension_semantics<parallel>], iteration_bounds = array<i64: 1>, scalar_prefetch = 0 : i64, scratch_operands = 0 : i64, tpu.core_type = #tpu.core_type<tc>, window_params = [{transform_indices = @transform_0, window_bounds = array<i64: 1, 2>}, {transform_indices = @transform_1, window_bounds = array<i64: 16, 32>}, {transform_indices = @transform_2, window_bounds = array<i64: 16, 32>}, {transform_indices = @transform_3, window_bounds = array<i64: 16, 32>}]} {
    %c0 = arith.constant 0 : index
    %c0_0 = arith.constant 0 : index
    %0 = memref.load %arg1[%c0, %c0_0] : memref<1x2xf32, #tpu.memory_space<smem>>
    %c0_1 = arith.constant 0 : index
    %c1 = arith.constant 1 : index
    %1 = memref.load %arg1[%c0_1, %c1] : memref<1x2xf32, #tpu.memory_space<smem>>
    %c0_2 = arith.constant 0 : index
    %c0_3 = arith.constant 0 : index
    %2 = vector.load %arg2[%c0_2, %c0_3] : memref<16x32xf32, #tpu.memory_space<vmem>>, vector<16x32xf32>
    %3 = vector.broadcast %0 : f32 to vector<16x32xf32>
    %4 = arith.mulf %3, %2 : vector<16x32xf32>
    %c0_4 = arith.constant 0 : index
    %c0_5 = arith.constant 0 : index
    %5 = vector.load %arg3[%c0_4, %c0_5] : memref<16x32xf32, #tpu.memory_space<vmem>>, vector<16x32xf32>
    %6 = vector.broadcast %1 : f32 to vector<16x32xf32>
    %7 = arith.mulf %6, %5 : vector<16x32xf32>
    %8 = arith.addf %4, %7 : vector<16x32xf32>
    %c0_6 = arith.constant 0 : index
    %c0_7 = arith.constant 0 : index
    %9 = vector.load %arg4[%c0_6, %c0_7] : memref<16x32xf32, #tpu.memory_space<vmem>>, vector<16x32xf32>
    tpu.vector_store %arg4[%c0_6, %c0_7], %8 {strides = array<i32>} : memref<16x32xf32, #tpu.memory_space<vmem>>, vector<16x32xf32>,
    return
  }
  func.func @transform_0(%arg0: i32) -> (i32, i32) {
    %c0_i32 = arith.constant 0 : i32
    %c0_i32_0 = arith.constant 0 : i32
    %c0_i32_1 = arith.constant 0 : i32
    return %c0_i32, %c0_i32_0 : i32, i32
  }
  func.func @transform_1(%arg0: i32) -> (i32, i32) {
    %c0_i32 = arith.constant 0 : i32
    %c0_i32_0 = arith.constant 0 : i32
    return %arg0, %c0_i32 : i32, i32
  }
  func.func @transform_2(%arg0: i32) -> (i32, i32) {
    %c0_i32 = arith.constant 0 : i32
    %c0_i32_0 = arith.constant 0 : i32
    return %arg0, %c0_i32 : i32, i32
  }
  func.func @transform_3(%arg0: i32) -> (i32, i32) {
    %c0_i32 = arith.constant 0 : i32
    %c0_i32_0 = arith.constant 0 : i32
    return %arg0, %c0_i32 : i32, i32
  }
}

</mosaic_0001>

<bundles_post_ra>
// kernel: tpu_custom_call.1
= control target key start
LH: loop header
LB: loop body
LE: loop exit
PB: predicated region body
PF: predicated region fallthrough
CT: control target
= control target key end

     0   :  { %8 = vsyncpa [#allocation5], 0  ;;  %s264_s0 = inlined_call_operand.hbm [shape: f32[1,2], index: 0, kind: input, shape index: {}]   ;;  %s265_s1 = inlined_call_operand.hbm [shape: f32[16,32], index: 1, kind: input, shape index: {}]   ;;  %s266_s2 = inlined_call_operand.hbm [shape: f32[16,32], index: 2, kind: input, shape index: {}]   ;;  %s267_s3 = inlined_call_operand.hbm [shape: f32[16,32], index: 3, kind: output, shape index: {}]  }
   0x1   :  { %9 = vsyncpa [#allocation3], 0 }
   0x2   :  { %10 = vsyncpa [#allocation8], 0 }
   0x3   :  { %11 = vsyncpa [#allocation4], 0  ;;  %s97_s14 = scalar_lea.hbm %s264_s0, 16 }
   0x4   :  { %p98_p0 = scmp.ne.s32.totalorder %s264_s0, %s97_s14  ;;  %p101_p1 = scmp.lt.u32.totalorder %s97_s14, %s264_s0 }
   0x6   :  { %p103_p2 = pnand %p101_p1, %p98_p0 }
   0x8   :  { %106 = shalt.err (!%p103_p2)
}
   0x9   :  { %s181_s19 = smov [#allocation2]   ;;  %s182_s22 = smov [#allocation6]  }
   0xa   :  { %19 = dma.hbm_to_smem %s264_s0, 16, %s181_s19, [#allocation5]  }
   0xb   :  { %s25_s23 = sshll.u32 %s182_s22, 4  ;;  %s107_s26 = scalar_lea.hbm %s265_s1, 256  ;;  %s26_s23 = int_to_ptr.vmem [resolvable:$true] %s25_s23 }
   0xc   :  { %p108_p3 = scmp.ne.s32.totalorder %s265_s1, %s107_s26  ;;  %p111_p4 = scmp.lt.u32.totalorder %s107_s26, %s265_s1 }
   0xe   :  { %p113_p5 = pnand %p111_p4, %p108_p3 }
  0x10   :  { %116 = shalt.err (!%p113_p5)
}
  0x11   :  { %s117_s4 = scalar_lea.vmem %s26_s23, 256  ;;  %p122_p7 = scmp.lt.s32.totalorder %s26_s23, %s26_s23 }
  0x12   :  { %p118_p6 = scmp.ne.s32.totalorder %s26_s23, %s117_s4  ;;  %p123_p8 = scmp.lt.s32.totalorder %s117_s4, %s117_s4 }
  0x14   :  { %p124_p9 = por %p123_p8, %p122_p7 }
  0x16   :  { %p125_p10 = pnand %p124_p9, %p118_p6 }
  0x18   :  { %128 = shalt.err (!%p125_p10)
}
  0x19   :  { %s183_s0 = smov 128   ;;  %s184_s5 = smov 8  }
  0x1a   :  { %31 = dma.hbm_to_vmem [thread:$0]  %s265_s1, 256, %s26_s23, [#allocation3], %s183_s0, %s183_s0, %s184_s5  }
  0x1b   :  { %s185_s8 = smov [#allocation7]   ;;  %s129_s12 = scalar_lea.hbm %s266_s2, 256 }
  0x1c   :  { %s37_s9 = sshll.u32 %s185_s8, 4  ;;  %p130_p11 = scmp.ne.s32.totalorder %s266_s2, %s129_s12  ;;  %s38_s9 = int_to_ptr.vmem [resolvable:$true] %s37_s9 }
  0x1d   :  { %p133_p12 = scmp.lt.u32.totalorder %s129_s12, %s266_s2 }
  0x1f   :  { %p135_p13 = pnand %p133_p12, %p130_p11 }
  0x21   :  { %138 = shalt.err (!%p135_p13)
}
  0x22   :  { %s139_s17 = scalar_lea.vmem %s38_s9, 256  ;;  %p144_p1 = scmp.lt.s32.totalorder %s38_s9, %s38_s9 }
  0x23   :  { %p140_p0 = scmp.ne.s32.totalorder %s38_s9, %s139_s17  ;;  %p145_p2 = scmp.lt.s32.totalorder %s139_s17, %s139_s17 }
  0x25   :  { %p146_p3 = por %p145_p2, %p144_p1 }
  0x27   :  { %p147_p4 = pnand %p146_p3, %p140_p0 }
  0x29   :  { %150 = shalt.err (!%p147_p4)
}
  0x2a   :  { %43 = dma.hbm_to_vmem [thread:$0]  %s266_s2, 256, %s38_s9, [#allocation8], %s183_s0, %s183_s0, %s184_s5  }
  0x2b   :  { %173 = dma.done.wait [#allocation5], 16  }
  0x2c   :  { %174 = vsyncadd [#allocation5], 4294967280 }
  0x2d   :  { %175 = dma.done.wait [#allocation3], 256  }
  0x2e   :  { %176 = vsyncadd [#allocation3], 4294967040 }
  0x2f   :  { %177 = dma.done.wait [#allocation8], 256  }
  0x30   :  { %178 = vsyncadd [#allocation8], 4294967040 }
  0x31   :  { %53 = sfence }
  0x32   :  { %s54_s19 = sld [smem:[#allocation2]]  ;;  %s90_s20 = sld [smem:[#allocation2 + $0x1]]  ;;  %v56_v0 = vld [vmem:[#allocation6] sm:$0xff]  ;;  %v61_v1 = vld [vmem:[#allocation7] sm:$0xff]  ;;  %v57_v2 = vld [vmem:[#allocation6 + $0x8] sm:$0xff]  ;;  %vm68_vm0 = vcmask 261120  }
  0x33   :  { %v62_v3 = vld [vmem:[#allocation7 + $0x8] sm:$0xff]  ;;  %s186_s21 = smov [#allocation9]  }
  0x34   :  { %s76_s22 = sshll.u32 %s186_s21, 4  ;;  %s77_s22 = int_to_ptr.vmem [resolvable:$true] %s76_s22 }
  0x35   :  { %s151_s2 = scalar_lea.vmem %s77_s22, 256  ;;  %p156_p6 = scmp.lt.s32.totalorder %s77_s22, %s77_s22 }
  0x36   :  { %p152_p5 = scmp.ne.s32.totalorder %s77_s22, %s151_s2  ;;  %p157_p7 = scmp.lt.s32.totalorder %s151_s2, %s151_s2 }
  0x38   :  { %v58_v4 = vstv %s54_s19  ;;  %v63_v5 = vstv %s90_s20  ;;  %p158_p8 = por %p157_p7, %p156_p6 }
  0x39   :  { %v59_v6 = vmul.f32 %v58_v4, %v56_v0  ;;  %v64_v7 = vmul.f32 %v63_v5, %v61_v1  ;;  %v60_v8 = vmul.f32 %v58_v4, %v57_v2  ;;  %v65_v9 = vmul.f32 %v63_v5, %v62_v3 }
  0x3a   :  { %p159_p9 = pnand %p158_p8, %p152_p5 }
  0x3b   :  { %v66_v10 = vadd.f32 %v64_v7, %v59_v6  ;;  %v67_v11 = vadd.f32 %v65_v9, %v60_v8 }
  0x3d   :  { %69 = vst.msk [vmem:[#allocation9] sm:$0xff] %vm68_vm0, %v66_v10  ;;  %70 = vst.msk [vmem:[#allocation9 + $0x8] sm:$0xff] %vm68_vm0, %v67_v11 }
  0x3e   :  { %162 = shalt.err (!%p159_p9)
}
  0x3f   :  { %s163_s25 = scalar_lea.hbm %s267_s3, 256 }
  0x40   :  { %p164_p10 = scmp.ne.s32.totalorder %s267_s3, %s163_s25  ;;  %p167_p11 = scmp.lt.u32.totalorder %s163_s25, %s267_s3 }
  0x42   :  { %p169_p12 = pnand %p167_p11, %p164_p10 }
  0x44   :  { %172 = shalt.err (!%p169_p12)
}
  0x45   :  { %82 = dma.vmem_to_hbm [thread:$0]  %s77_s22, 256, %s267_s3, [#allocation4], %s183_s0, %s183_s0, %s184_s5  }
  0x46   :  { %179 = dma.done.wait [#allocation4], 256  }
  0x47   :  { %180 = vsyncadd [#allocation4], 4294967040 }
  0x48   :  { %86 = vsyncpa [#allocation3], 1 }
  0x49   :  { %87 = vsyncpa [#allocation8], 1 }
  0x4a   :  { %88 = vsyncpa [#allocation4], 1 }
  0x4b   :  { %89 = vsyncpa [#allocation5], 1 }

</bundles_post_ra>
